<compile_context>
chip_gen: v5e
topology: v5e:2x2
jax: 0.10.0
libtpu: 0.0.40
codegen_flags: <defaults>
</compile_context>

<pallas_src>
import functools

import jax
import jax.numpy as jnp
from jax import lax
from jax.experimental import pallas as pl
from jax.experimental.pallas import tpu as pltpu

_VMEM_LIMIT = 32 * 1024 * 1024  # far above what our tiles need; safe on v5e/v6e/v7x
_MAX_SINGLE_K = 1536            # do the whole K reduction in one step up to this
_K_TILES = (1024, 768, 512, 384, 256, 128)
_N_TILES = (512, 384, 256, 128)


def _round_up(x, m):
    return ((x + m - 1) // m) * m


def _pick_tile(dim, candidates):
    for t in candidates:
        if dim % t == 0:
            return t
    return 128


# ----------------------------------------------------------------------------
# Pallas kernels
# ----------------------------------------------------------------------------
def _mm_kernel_2d(*refs, relu, has_res):
    """Single-K-step matmul + bias (+ residual) (+ ReLU). bf16 in, fp32 out."""
    if has_res:
        x_ref, w_ref, b_ref, r_ref, o_ref = refs
    else:
        x_ref, w_ref, b_ref, o_ref = refs
        r_ref = None
    y = jnp.dot(x_ref[...], w_ref[...], preferred_element_type=jnp.float32)
    y = y + b_ref[...]
    if r_ref is not None:
        y = y + r_ref[...]
    if relu:
        y = jnp.maximum(y, 0.0)
    o_ref[...] = y.astype(o_ref.dtype)


def _mm_kernel_3d(*refs, relu, has_res):
    """Multi-K-step matmul; accumulates into the resident fp32 output tile."""
    if has_res:
        x_ref, w_ref, b_ref, r_ref, o_ref = refs
    else:
        x_ref, w_ref, b_ref, o_ref = refs
        r_ref = None

    k = pl.program_id(2)

    @pl.when(k == 0)
    def _():
        o_ref[...] = jnp.zeros_like(o_ref)

    o_ref[...] += jnp.dot(x_ref[...], w_ref[...],
                          preferred_element_type=jnp.float32)

    @pl.when(k == pl.num_programs(2) - 1)
    def _():
        y = o_ref[...] + b_ref[...]
        if r_ref is not None:
            y = y + r_ref[...]
        if relu:
            y = jnp.maximum(y, 0.0)
        o_ref[...] = y.astype(o_ref.dtype)


def linear(x, pack, residual=None, relu=False):
    """y = act(x @ w + b [+ residual]) with pre-padded bf16 weight, folded BN."""
    M, K = x.shape
    wp = pack["w"]            # (Kp, Np) bf16, BN scale folded in
    bp = pack["b"]            # (1, Np)  fp32
    N = pack["n"]
    Kp, Np = wp.shape
    assert K <= Kp

    tm = min(128, _round_up(M, 8))
    Mp = _round_up(M, tm)
    tn = Np if Np <= 512 else _pick_tile(Np, _N_TILES)
    tk = Kp if Kp <= _MAX_SINGLE_K else _pick_tile(Kp, _K_TILES)
    nk = Kp // tk

    xp = jnp.pad(x.astype(jnp.bfloat16), ((0, Mp - M), (0, Kp - K)))
    inputs = [xp, wp, bp]
    has_res = residual is not None
    if has_res:
        rp = jnp.pad(residual.astype(jnp.float32),
                     ((0, Mp - M), (0, Np - residual.shape[1])))
        inputs.append(rp)

    if nk == 1:
        grid = (Mp // tm, Np // tn)
        in_specs = [
            pl.BlockSpec((tm, Kp), lambda i, j: (i, 0)),
            pl.BlockSpec((Kp, tn), lambda i, j: (0, j)),
            pl.BlockSpec((1, tn), lambda i, j: (0, j)),
        ]
        if has_res:
            in_specs.append(pl.BlockSpec((tm, tn), lambda i, j: (i, j)))
        out_spec = pl.BlockSpec((tm, tn), lambda i, j: (i, j))
        kernel = functools.partial(_mm_kernel_2d, relu=relu, has_res=has_res)
        dims = ("parallel", "parallel")
    else:
        grid = (Mp // tm, Np // tn, nk)
        in_specs = [
            pl.BlockSpec((tm, tk), lambda i, j, k: (i, k)),
            pl.BlockSpec((tk, tn), lambda i, j, k: (k, j)),
            pl.BlockSpec((1, tn), lambda i, j, k: (0, j)),
        ]
        if has_res:
            in_specs.append(pl.BlockSpec((tm, tn), lambda i, j, k: (i, j)))
        out_spec = pl.BlockSpec((tm, tn), lambda i, j, k: (i, j))
        kernel = functools.partial(_mm_kernel_3d, relu=relu, has_res=has_res)
        dims = ("parallel", "parallel", "arbitrary")

    out = pl.pallas_call(
        kernel,
        out_shape=jax.ShapeDtypeStruct((Mp, Np), jnp.float32),
        grid_spec=pltpu.PrefetchScalarGridSpec(
            num_scalar_prefetch=0,
            grid=grid,
            in_specs=in_specs,
            out_specs=out_spec),
        compiler_params=pltpu.CompilerParams(
            dimension_semantics=dims,
            vmem_limit_bytes=_VMEM_LIMIT),
    )(*inputs)
    return out[:M, :N]


def _attn_kernel(qkv_ref, o_ref, *, scale):
    """All-heads softmax(q k^T / sqrt(d)) v in one invocation."""
    q = qkv_ref[0].astype(jnp.bfloat16)           # (H, L, D)
    k = qkv_ref[1].astype(jnp.bfloat16)
    v = qkv_ref[2].astype(jnp.bfloat16)
    s = jnp.einsum("hld,hmd->hlm", q, k,
                   preferred_element_type=jnp.float32) * scale
    m = jnp.max(s, axis=-1, keepdims=True)
    p = jnp.exp(s - m)
    denom = jnp.sum(p, axis=-1, keepdims=True)
    p = p * pl.reciprocal(denom, approx=True)
    o_ref[...] = jnp.einsum("hlm,hmd->hld", p.astype(jnp.bfloat16), v,
                            preferred_element_type=jnp.float32)


def multihead_attention(x, in_pack, out_pack, num_heads=8):
    """Matches torch.nn.MultiheadAttention forward on unbatched (L, E) input."""
    L, E = x.shape
    D = E // num_heads
    qkv = linear(x, in_pack)                                     # (L, 3E) fp32
    qkv = qkv.reshape(L, 3, num_heads, D).transpose(1, 2, 0, 3)  # (3, H, L, D)

    attn = pl.pallas_call(
        functools.partial(_attn_kernel, scale=1.0 / float(D) ** 0.5),
        out_shape=jax.ShapeDtypeStruct((num_heads, L, D), jnp.float32),
        grid_spec=pltpu.PrefetchScalarGridSpec(
            num_scalar_prefetch=0,
            grid=(1,),
            in_specs=[pl.BlockSpec((3, num_heads, L, D),
                                   lambda i: (0, 0, 0, 0))],
            out_specs=pl.BlockSpec((num_heads, L, D), lambda i: (0, 0, 0)),
        ),
        compiler_params=pltpu.CompilerParams(
            dimension_semantics=("arbitrary",),
            vmem_limit_bytes=_VMEM_LIMIT),
    )(qkv)
    o = attn.transpose(1, 0, 2).reshape(L, E)
    return linear(o, out_pack)


# ----------------------------------------------------------------------------
# Conv glue (im2col + Pallas matmul)
# ----------------------------------------------------------------------------
def im2col(x, k, stride, pad):
    B, H, W, C = x.shape
    xp = jnp.pad(x, ((0, 0), (pad, pad), (pad, pad), (0, 0)))
    Ho = (H + 2 * pad - k) // stride + 1
    Wo = (W + 2 * pad - k) // stride + 1
    cols = []
    for i in range(k):
        for j in range(k):
            cols.append(xp[:, i:i + stride * Ho:stride,
                           j:j + stride * Wo:stride, :])
    return jnp.concatenate(cols, axis=-1), Ho, Wo


def conv1x1(x, pack, stride=1, residual=None, relu=False):
    if stride > 1:
        x = x[:, ::stride, ::stride, :]
    B, H, W, C = x.shape
    rf = residual.reshape(B * H * W, -1) if residual is not None else None
    y = linear(x.reshape(B * H * W, C), pack, residual=rf, relu=relu)
    return y.reshape(B, H, W, pack["n"])


def conv3x3(x, pack, relu=True):
    cols, Ho, Wo = im2col(x, 3, 1, 1)
    B = x.shape[0]
    y = linear(cols.reshape(B * Ho * Wo, -1), pack, relu=relu)
    return y.reshape(B, Ho, Wo, pack["n"])


# ----------------------------------------------------------------------------
# Parameters (weights pre-padded / bf16, BN folded at build time)
# ----------------------------------------------------------------------------
def _prep_linear(w, bias=None, bn=None):
    """Fold BN into weight columns, pad to tile multiples, cast weight to bf16."""
    K, N = w.shape
    if bn is not None:
        scale, bn_bias = bn
        w = w * scale[None, :]
        b = bn_bias if bias is None else bias * scale + bn_bias
    else:
        b = jnp.zeros((N,), jnp.float32) if bias is None else bias
    Kp = _round_up(K, 128)
    Np = _round_up(N, 512) if N > 512 else _round_up(N, 128)
    wp = jnp.pad(w, ((0, Kp - K), (0, Np - N))).astype(jnp.bfloat16)
    bp = jnp.pad(b.reshape(1, N), ((0, 0), (0, Np - N))).astype(jnp.float32)
    return {"w": wp, "b": bp, "n": N}


class ParamGen:
    def __init__(self, seed):
        self.key = jax.random.PRNGKey(seed)

    def normal(self, shape, std):
        self.key, sub = jax.random.split(self.key)
        return std * jax.random.normal(sub, shape, jnp.float32)

    def conv(self, fan_in, fan_out):
        return self.normal((fan_in, fan_out), (2.0 / fan_in) ** 0.5)

    def xavier(self, fan_in, fan_out):
        return self.normal((fan_in, fan_out), (2.0 / (fan_in + fan_out)) ** 0.5)

    def bn(self, c):
        gamma = 1.0 + self.normal((c,), 0.1)
        beta = self.normal((c,), 0.1)
        mean = self.normal((c,), 0.1)
        var = 1.0 + jnp.abs(self.normal((c,), 0.1))
        scale = gamma * lax.rsqrt(var + 1e-5)           # eps of nn.BatchNorm2d
        bias = beta - mean * scale
        return (scale, bias)


def make_block_params(g, cin, cmid, cout, stride, use_mhsa):
    p = {"conv1": _prep_linear(g.conv(cin, cmid), bn=g.bn(cmid))}
    if use_mhsa:
        p["c2a"] = _prep_linear(g.conv(cmid, 512))                  # no BN
        p["mhsa_in"] = _prep_linear(g.xavier(512, 3 * 512),
                                    bias=g.normal((3 * 512,), 0.02))
        p["mhsa_out"] = _prep_linear(g.xavier(512, 512),
                                     bias=g.normal((512,), 0.02))
        p["c2b"] = _prep_linear(g.conv(512, cmid))                  # no BN
    else:
        p["conv2"] = _prep_linear(g.conv(9 * cmid, cmid), bn=g.bn(cmid))
    p["conv3"] = _prep_linear(g.conv(cmid, cout), bn=g.bn(cout))
    if stride != 1 or cin != cout:
        p["sc"] = _prep_linear(g.conv(cin, cout), bn=g.bn(cout))
    return p


def make_layer_params(g, cin, cmid, cout, num_blocks, stride, use_mhsa=False):
    blocks, strides = [], [stride] + [1] * (num_blocks - 1)
    for s in strides:
        blocks.append((make_block_params(g, cin, cmid, cout, s, use_mhsa),
                       s, use_mhsa))
        cin = cout
    return blocks


def make_resnet_mhsa_params(seed=0, num_classes=7001):
    g = ParamGen(seed)
    return {
        "conv1": _prep_linear(g.conv(49 * 3, 64), bn=g.bn(64)),   # 7x7, im2col
        "layer1": make_layer_params(g, 64, 64, 256, 3, 1),
        "layer2": make_layer_params(g, 256, 128, 512, 5, 2),
        "layer3": make_layer_params(g, 512, 256, 1024, 5, 2),
        "layer4": make_layer_params(g, 1024, 512, 1024, 3, 2, use_mhsa=True),
        "fc": _prep_linear(g.normal((1024, num_classes), 0.01),
                           bias=jnp.zeros((num_classes,), jnp.float32)),
    }


# ----------------------------------------------------------------------------
# ResNetMHSA model
# ----------------------------------------------------------------------------
def residual_block(x, p, stride, use_mhsa):
    identity = x
    h = conv1x1(x, p["conv1"], stride=stride, relu=True)
    if use_mhsa:
        h = conv1x1(h, p["c2a"])                       # conv2_1x1_1 (no BN)
        B, H, W, C = h.shape
        tokens = h.reshape(B * H * W, C)               # == permute(0,2,3,1).reshape
        tokens = multihead_attention(tokens, p["mhsa_in"], p["mhsa_out"])
        h = tokens.reshape(B, H, W, C)
        h = conv1x1(h, p["c2b"])                       # conv2_1x1_2 (no BN)
    else:
        h = conv3x3(h, p["conv2"], relu=True)

    if "sc" in p:    # projection shortcut
        main = conv1x1(h, p["conv3"], relu=False)
        out = conv1x1(identity, p["sc"], stride=stride,
                      residual=main, relu=True)
    else:            # identity shortcut, fused into conv3 epilogue
        out = conv1x1(h, p["conv3"], residual=identity, relu=True)
    return out


def resnet_mhsa_forward(x_nchw, params):
    # layout: NCHW in (PyTorch convention) -> NHWC internally.
    x = jnp.transpose(x_nchw, (0, 2, 3, 1)).astype(jnp.float32)
    B = x.shape[0]

    # stem: 7x7 s2 p3 conv + BN + ReLU, then 3x3 s2 p1 maxpool
    cols, Ho, Wo = im2col(x, 7, 2, 3)
    h = linear(cols.reshape(B * Ho * Wo, -1), params["conv1"],
               relu=True).reshape(B, Ho, Wo, 64)
    h = lax.reduce_window(h, -jnp.inf, lax.max, (1, 3, 3, 1), (1, 2, 2, 1),
                          ((0, 0), (1, 1), (1, 1), (0, 0)))

    for layer in ("layer1", "layer2", "layer3", "layer4"):
        for blk, s, use_mhsa in params[layer]:
            h = residual_block(h, blk, s, use_mhsa)

    pooled = jnp.mean(h, axis=(1, 2))                  # AdaptiveAvgPool2d((1,1))
    return linear(pooled, params["fc"])


if __name__ == "__main__":
    num_classes = 7001
    key = jax.random.PRNGKey(0)
    x = jax.random.normal(key, (2, 3, 64, 64), jnp.float32)   # small NCHW input
    params = make_resnet_mhsa_params(seed=0, num_classes=num_classes)

    out = resnet_mhsa_forward(x, params)
    out = jax.block_until_ready(out)

    assert out.shape == (2, num_classes), out.shape
    assert bool(jnp.all(jnp.isfinite(out)))
    print("KERNEL_OK")
</pallas_src>

<mosaic_0001>
module attributes {stable_mosaic.version = 11 : i64} {
  func.func @_mm_kernel_2d(%arg0: i32, %arg1: i32, %arg2: memref<128x256xbf16, #tpu.memory_space<vmem>>, %arg3: memref<256x128xbf16, #tpu.memory_space<vmem>>, %arg4: memref<1x128xf32, #tpu.memory_space<vmem>>, %arg5: memref<128x128xf32, #tpu.memory_space<vmem>>) attributes {dimension_semantics = [#tpu.dimension_semantics<parallel>, #tpu.dimension_semantics<parallel>], iteration_bounds = array<i64: 16, 1>, scalar_prefetch = 0 : i64, scratch_operands = 0 : i64, tpu.core_type = #tpu.core_type<tc>, window_params = [{transform_indices = @transform_0, window_bounds = array<i64: 128, 256>}, {transform_indices = @transform_1, window_bounds = array<i64: 256, 128>}, {transform_indices = @transform_2, window_bounds = array<i64: 1, 128>}, {transform_indices = @transform_3, window_bounds = array<i64: 128, 128>}]} {
    %c0 = arith.constant 0 : index
    %c0_0 = arith.constant 0 : index
    %0 = vector.load %arg2[%c0, %c0_0] : memref<128x256xbf16, #tpu.memory_space<vmem>>, vector<128x256xbf16>
    %c0_1 = arith.constant 0 : index
    %c0_2 = arith.constant 0 : index
    %1 = vector.load %arg3[%c0_1, %c0_2] : memref<256x128xbf16, #tpu.memory_space<vmem>>, vector<256x128xbf16>
    %cst = arith.constant dense<0.000000e+00> : vector<128x128xf32>
    %2 = tpu.matmul %0, %1, %cst {dimension_numbers = #tpu.dot_dimension_numbers<[1], [0], [0], [1], [0, 0, 1, 1], [], []>} : vector<128x256xbf16>, vector<256x128xbf16>, vector<128x128xf32> -> vector<128x128xf32>
    %c0_3 = arith.constant 0 : index
    %c0_4 = arith.constant 0 : index
    %3 = vector.load %arg4[%c0_3, %c0_4] : memref<1x128xf32, #tpu.memory_space<vmem>>, vector<1x128xf32>
    %4 = vector.broadcast %3 : vector<1x128xf32> to vector<128x128xf32>
    %5 = arith.addf %2, %4 : vector<128x128xf32>
    %cst_5 = arith.constant 0.000000e+00 : f32
    %6 = vector.broadcast %cst_5 : f32 to vector<128x128xf32>
    %7 = arith.maximumf %5, %6 : vector<128x128xf32>
    %c0_6 = arith.constant 0 : index
    %c0_7 = arith.constant 0 : index
    %8 = vector.load %arg5[%c0_6, %c0_7] : memref<128x128xf32, #tpu.memory_space<vmem>>, vector<128x128xf32>
    tpu.vector_store %arg5[%c0_6, %c0_7], %7 {strides = array<i32>} : memref<128x128xf32, #tpu.memory_space<vmem>>, vector<128x128xf32>,
    return
  }
  func.func @transform_0(%arg0: i32, %arg1: i32) -> (i32, i32) {
    %c0_i32 = arith.constant 0 : i32
    %c0_i32_0 = arith.constant 0 : i32
    return %arg0, %c0_i32 : i32, i32
  }
  func.func @transform_1(%arg0: i32, %arg1: i32) -> (i32, i32) {
    %c0_i32 = arith.constant 0 : i32
    %c0_i32_0 = arith.constant 0 : i32
    return %c0_i32, %arg1 : i32, i32
  }
  func.func @transform_2(%arg0: i32, %arg1: i32) -> (i32, i32) {
    %c0_i32 = arith.constant 0 : i32
    %c0_i32_0 = arith.constant 0 : i32
    return %c0_i32, %arg1 : i32, i32
  }
  func.func @transform_3(%arg0: i32, %arg1: i32) -> (i32, i32) {
    %c0_i32 = arith.constant 0 : i32
    return %arg0, %arg1 : i32, i32
  }
}

</mosaic_0001>

<bundles_post_ra>
// kernel: tpu_custom_call.1
= control target key start
LH: loop header
LB: loop body
LE: loop exit
PB: predicated region body
PF: predicated region fallthrough
CT: control target
= control target key end

     0   :  { %s1406_s0 = inlined_call_operand.hbm [shape: bf16[2048,256], index: 0, kind: input, shape index: {}]   ;;  %s1407_s1 = inlined_call_operand.hbm [shape: bf16[256,128], index: 1, kind: input, shape index: {}]   ;;  %s1408_s2 = inlined_call_operand.vmem [shape: f32[1,128], index: 2, kind: input, shape index: {}]   ;;  %s1409_s3 = inlined_call_operand.hbm [shape: f32[2048,128], index: 3, kind: output, shape index: {}]  }
   0x1   :  { %1410 = sst [smem:[#allocation11_spill]] %s1407_s1 }
   0x2   :  { %8 = vsyncpa [#allocation3], 0 }
   0x3   :  { %10 = vsyncpa [#allocation3 + $0x1], 0 }
   0x4   :  { %11 = vsyncpa [#allocation6], 0 }
   0x5   :  { %12 = vsyncpa [#allocation4], 0 }
   0x6   :  { %14 = vsyncpa [#allocation4 + $0x1], 0  ;;  %s1181_s12 = smov 0   ;;  %s1183_s13 = smov 0  }
   0x7   :  { %s1185_s14 = smov 0   ;;  %s1187_s15 = smov 0  }
   0x8   :  { %s1189_s16 = smov 0   ;;  %s1191_s17 = smov 0  }
   0x9 LB: > { %s728_s18 = sadd.s32 4294967295, %s1152_s17   ;;  %s729_s19 = sadd.s32 4294967294, %s1152_s17   ;;  %s1152_s17 = sphi %s1191_s17, %s20_s17   ;;  %s1148_s16 = sphi %s1189_s16, %s1423_s16   ;;  %s1144_s15 = sphi %s1187_s15, %s1422_s15   ;;  %s1140_s14 = sphi %s1185_s14, %s1421_s14   ;;  %s1136_s13 = sphi %s1183_s13, %s1420_s13   ;;  %s1132_s12 = sphi %s1181_s12, %s1419_s12  }
   0xa   : > { %p52_p0 = scmp.ne.s32.totalorder %s1136_s13, %s1132_s12  ;;  %p1215_p1 = scmp.eq.s32.totalorder %s728_s18, 0 }
   0xb   : > { %p1219_p2 = scmp.eq.s32.totalorder %s728_s18, 15  ;;  %p136_p3 = scmp.eq.s32.totalorder %s729_s19, 15 }
   0xc   : > { %p1225_p4 = por %p1215_p1, %p52_p0  ;;  %p730_p5 = scmp.ge.s32.totalorder %s1152_s17, 1 }
   0xd   : > { %p1230_p6 = por %p136_p3, %p52_p0  ;;  %p143_p7 = scmp.lt.s32.totalorder %s1152_s17, 17 }
   0xe   : > { %s1415_s1 = sld [smem:[#allocation11_spill]]  ;;  %s1154_s28 = smov [#allocation5]  }
   0xf   : > { %p1238_p8 = pnand %p730_p5, %p143_p7  ;;  %s158_s29 = sshll.u32 %s1154_s28, 4  ;;  %s159_s29 = int_to_ptr.vmem [resolvable:$true] %s158_s29 }
  0x10   : > { %s1155_s30 = smov 64   ;;  %s1156_s4 = smov 4  }
  0x11   : > { %p934_p9 = pneg %p1238_p8  ;;  %s32_s5 = sadd.s32 1, %s1148_s16 }
  0x12   : > { %p34_p11 = scmp.ge.s32.totalorder %s32_s5, 16  ;;  %s39_s6 = sadd.s32 1, %s1140_s14 }
  0x13   : > { %p935_p10 = pnand %p934_p9, %p1215_p1  ;;  %p46_p12 = scmp.ne.s32.totalorder %s1140_s14, %s1136_s13 }
  0x14   : > { %s156_s26 = sshll.u32 %s1415_s1, 4  ;;  %p47_p13 = scmp.eq.s32.totalorder %s1152_s17, 0  ;;  %s157_s26 = int_to_ptr.hbm [resolvable:$true] %s156_s26 }
  0x15   : > { %937 = dma.hbm_to_vmem [thread:$0]  (!%p935_p10), %s157_s26, 2048, %s159_s29, [#allocation6], %s1155_s30, %s1155_s30, %s1156_s4  }
  0x16   : > { %s1425_s5 = smov (%p34_p11, %s32_s5), 0  ;;  %p1253_p0 = por %p47_p13, %p46_p12 }
  0x17   : > { %p1259_p3 = por %p1219_p2, %p46_p12  ;;  %s36_s9 = ssub.s32 %s1148_s16, %s1425_s5 }
  0x18   : > { %p947_p5 = scmp.lt.s32.totalorder %s1152_s17, 16  ;;  %p37_p7 = scmp.eq.s32.totalorder %s36_s9, 0 }
  0x19   : > { %s178_s10 = sand.u32 1, %s1140_s14   ;;  %s876_s19 = sshll.u32 %s1148_s16, 7 }
  0x1a   : > { %s734_s11 = sshll.u32 %s178_s10, 7  ;;  %s188_s26 = scalar_lea.hbm %s1406_s0, %s876_s19 }
  0x1b   : > { %s1268_s18 = scalar_select %p37_p7, %s1140_s14, %s39_s6  }
  0x1c   : > { %s182_s28 = scalar_lea.vmem [#allocation2], %s734_s11  ;;  %s189_s21 = sshll.u32 %s188_s26, 4  ;;  %s190_s21 = int_to_ptr.hbm [resolvable:$true] %s189_s21 }
  0x1d   : > { %s191_s29 = sshll.u32 %s182_s28, 4  ;;  %p939_p2 = pnand %p947_p5, %p1253_p0  ;;  %s192_s29 = int_to_ptr.vmem [resolvable:$true] %s191_s29 }
  0x1e   : > { %s179_s30 = scalar_lea.sflag [#allocation3], %s178_s10  ;;  %s1157_s4 = smov 128  }
  0x1f   : > { %s1158_s1 = smov 8   ;;  %203 = sbr.rel (%p1238_p8) target bundleno = 269 (0x10d), region = 32 }
  0x20   : > { %941 = dma.hbm_to_vmem [thread:$0]  (!%p939_p2), %s190_s21, 2048, %s192_s29, %s179_s30, %s1157_s4, %s1157_s4, %s1158_s1  }
  0x21   : > { %s1279_s6 = sand.u32 (!%p1238_p8), 1, %s1136_s13  }
  0x22   : > { %s739_s9 = sshll.u32 (!%p1238_p8), %s1279_s6, 7  ;;  %s206_s11 = scalar_lea.sflag (!%p1238_p8), [#allocation3], %s1279_s6 }
  0x23   : > { %s1285_s19 = scalar_lea.vmem (!%p1238_p8), [#allocation2], %s739_s9 }
  0x24   : > { %1119 = dma.done.wait (%p1225_p4), %s206_s11, 2048  }
  0x25   : > { %1121 = vsyncadd (%p1225_p4), %s206_s11, 4294965248 }
  0x26   : > { %1123 = dma.done.wait (%p1215_p1), [#allocation6], 2048  }
  0x27   : > { %1125 = vsyncadd (%p1215_p1), [#allocation6], 4294965248  ;;  %v900_v0 = vld [vmem:[#allocation5 + $0x38] sm:$0xff]  ;;  %v899_v2 = vld [vmem:[#allocation5 + $0x30] sm:$0xff]  ;;  %s1335_s22 = scalar_lea.vmem [#allocation7], %s739_s9  ;;  %s909_s27 = sshll.u32 %s1144_s15, 7 }
  0x28   : > { %v908_v1 = vld [vmem:[#allocation5 + $0x78] sm:$0xff]  ;;  %474 = vmatpush.bf16.msra.mxu0 %v900_v0  ;;  %910 = vmatpush.bf16.msra.mxu2 %v900_v0  ;;  %v907_v3 = vld [vmem:[#allocation5 + $0x70] sm:$0xff]  ;;  %v898_v4 = vld [vmem:[#allocation5 + $0x28] sm:$0xff]  ;;  %s617_s24 = scalar_lea.hbm %s1409_s3, %s909_s27  ;;  %s618_s25 = sshll.u32 %s1335_s22, 4  ;;  %s619_s25 = int_to_ptr.vmem [resolvable:$true] %s618_s25 }
  0x29   : > { %523 = vmatpush.bf16.msra.mxu1 %v908_v1  ;;  %918 = vmatpush.bf16.msra.mxu3 %v908_v1  ;;  %v906_v5 = vld [vmem:[#allocation5 + $0x68] sm:$0xff]  ;;  %v897_v6 = vld [vmem:[#allocation5 + $0x20] sm:$0xff]  ;;  %v896_v8 = vld [vmem:[#allocation5 + $0x18] sm:$0xff]  ;;  %s620_s26 = sshll.u32 %s617_s24, 4  ;;  %s605_s15 = scalar_lea.sflag [#allocation4], %s1279_s6  ;;  %s621_s26 = int_to_ptr.hbm [resolvable:$true] %s620_s26 }
  0x2a   : > { %v905_v7 = vld [vmem:[#allocation5 + $0x60] sm:$0xff]  ;;  %v904_v9 = vld [vmem:[#allocation5 + $0x58] sm:$0xff]  ;;  %v895_v10 = vld [vmem:[#allocation5 + $0x10] sm:$0xff]  ;;  %s1080_s28 = sshra.s32 %s621_s26, 4  ;;  %s1086_s4 = scalar_lea.hbm %s1409_s3, 2048  ;;  %s1081_s28 = int_to_ptr.hbm [resolvable:$true] %s1080_s28 }
  0x2b   : > { %v903_v11 = vld [vmem:[#allocation5 + $0x50] sm:$0xff]  ;;  %v894_v12 = vld [vmem:[#allocation5 + $0x8] sm:$0xff]  ;;  %v893_v14 = vld [vmem:[#allocation5] sm:$0xff]  ;;  %s1082_s29 = scalar_lea.hbm %s1081_s28, 128  ;;  %p1087_p9 = scmp.lt.s32.totalorder %s1081_s28, %s1409_s3 }
  0x2c   : > { %475 = vmatpush.bf16.msra.mxu0 %v899_v2  ;;  %911 = vmatpush.bf16.msra.mxu2 %v899_v2  ;;  %v902_v13 = vld [vmem:[#allocation5 + $0x48] sm:$0xff]  ;;  %v901_v15 = vld [vmem:[#allocation5 + $0x40] sm:$0xff]  ;;  %v752_v28 = vld [vmem:[%s1285_s19 + $0x10] sm:$0xf]  ;;  %p1083_p1 = scmp.ne.s32.totalorder %s1081_s28, %s1082_s29  ;;  %p1088_p10 = scmp.lt.s32.totalorder %s1086_s4, %s1082_s29 }
  0x2d   : > { %524 = vmatpush.bf16.msra.mxu1 %v907_v3  ;;  %919 = vmatpush.bf16.msra.mxu3 %v907_v3  ;;  %v744_v16 = vld [vmem:[%s1285_s19] sm:$0xf]  ;;  %v878_v17 = vld [vmem:[%s1285_s19 + $0x4] sm:$0xf0]  ;;  %v877_v20 = vld [vmem:[%s1285_s19 + $0x4] sm:$0xf] }
  0x2e   : > { %v776_v18 = vld [vmem:[%s1285_s19 + $0x40] sm:$0xf]  ;;  %v886_v19 = vld [vmem:[%s1285_s19 + $0x44] sm:$0xf0]  ;;  %v746_v21 = vld [vmem:[%s1285_s19 + $0x8] sm:$0xf0]  ;;  %v745_v24 = vor.u32 %v878_v17, %v744_v16  ;;  %p1084_p4 = pnand %p1083_p1, %p1259_p3  ;;  %p1089_p11 = por %p1088_p10, %p1087_p9 }
  0x2f   : > { %v885_v22 = vld [vmem:[%s1285_s19 + $0x44] sm:$0xf]  ;;  %v778_v23 = vld [vmem:[%s1285_s19 + $0x48] sm:$0xf0]  ;;  %v777_v25 = vor.u32 %v886_v19, %v776_v18  ;;  %v749_v26 = vor.u32 %v877_v20, %v746_v21  ;;  %v880_v29 = vld [vmem:[%s1285_s19 + $0x14] sm:$0xf0] }
  0x30   : > { %476 = vmatpush.bf16.msra.mxu0 %v898_v4  ;;  %912 = vmatpush.bf16.msra.mxu2 %v898_v4  ;;  %v781_v27 = vor.u32 %v885_v22, %v778_v23  ;;  %v784_v30 = vld [vmem:[%s1285_s19 + $0x50] sm:$0xf]  ;;  %v888_v31 = vld [vmem:[%s1285_s19 + $0x54] sm:$0xf0]  ;;  %v879_v32 = vld [vmem:[%s1285_s19 + $0x14] sm:$0xf]  ;;  %v753_v36 = vor.u32 %v880_v29, %v752_v28  ;;  %p1085_p8 = pneg %p1084_p4 }
  0x31   : > { %525 = vmatpush.bf16.msra.mxu1 %v906_v5  ;;  %920 = vmatpush.bf16.msra.mxu3 %v906_v5  ;;  %v754_v33 = vld [vmem:[%s1285_s19 + $0x18] sm:$0xf0]  ;;  %v887_v34 = vld [vmem:[%s1285_s19 + $0x54] sm:$0xf]  ;;  %v785_v37 = vor.u32 %v888_v31, %v784_v30  ;;  %v760_v40 = vld [vmem:[%s1285_s19 + $0x20] sm:$0xf] }
  0x32   : > { %v786_v35 = vld [vmem:[%s1285_s19 + $0x58] sm:$0xf0]  ;;  %v757_v38 = vor.u32 %v879_v32, %v754_v33  ;;  %v882_v41 = vld [vmem:[%s1285_s19 + $0x24] sm:$0xf0]  ;;  %v792_v42 = vld [vmem:[%s1285_s19 + $0x60] sm:$0xf]  ;;  %p1090_p12 = pnand %p1089_p11, %p1085_p8 }
  0x33   : > { %v789_v39 = vor.u32 %v887_v34, %v786_v35  ;;  %v890_v43 = vld [vmem:[%s1285_s19 + $0x64] sm:$0xf0]  ;;  %v881_v44 = vld [vmem:[%s1285_s19 + $0x24] sm:$0xf]  ;;  %v762_v45 = vld [vmem:[%s1285_s19 + $0x28] sm:$0xf0]  ;;  %v761_v48 = vor.u32 %v882_v41, %v760_v40 }
  0x34   : > { %477 = vmatpush.bf16.msra.mxu0 %v897_v6  ;;  %913 = vmatpush.bf16.msra.mxu2 %v897_v6  ;;  %v889_v46 = vld [vmem:[%s1285_s19 + $0x64] sm:$0xf]  ;;  %v794_v47 = vld [vmem:[%s1285_s19 + $0x68] sm:$0xf0]  ;;  %v793_v49 = vor.u32 %v890_v43, %v792_v42  ;;  %v765_v50 = vor.u32 %v881_v44, %v762_v45  ;;  %v768_v52 = vld [vmem:[%s1285_s19 + $0x30] sm:$0xf] }
  0x35   : > { %526 = vmatpush.bf16.msra.mxu1 %v905_v7  ;;  %921 = vmatpush.bf16.msra.mxu3 %v905_v7  ;;  %v797_v51 = vor.u32 %v889_v46, %v794_v47  ;;  %v884_v53 = vld [vmem:[%s1285_s19 + $0x34] sm:$0xf0]  ;;  %v800_v54 = vld [vmem:[%s1285_s19 + $0x70] sm:$0xf]  ;;  %v883_v56 = vld [vmem:[%s1285_s19 + $0x34] sm:$0xf] }
  0x36   : > { %v892_v55 = vld [vmem:[%s1285_s19 + $0x74] sm:$0xf0]  ;;  %v770_v57 = vld [vmem:[%s1285_s19 + $0x38] sm:$0xf0]  ;;  %v891_v58 = vld [vmem:[%s1285_s19 + $0x74] sm:$0xf]  ;;  %v769_v60 = vor.u32 %v884_v53, %v768_v52 }
  0x37   : > { %v802_v59 = vld [vmem:[%s1285_s19 + $0x78] sm:$0xf0]  ;;  %v801_v61 = vor.u32 %v892_v55, %v800_v54  ;;  %v773_v62 = vor.u32 %v883_v56, %v770_v57  ;;  %v1330_v0 = vld [vmem:[%s1408_s2] ss:$0 sm:$0xff] }
  0x38   : > { %478 = vmatpush.bf16.msra.mxu0 %v896_v8  ;;  %914 = vmatpush.bf16.msra.mxu2 %v896_v8  ;;  %v805_v63 = vor.u32 %v891_v58, %v802_v59 }
  0x39   : > { %527 = vmatpush.bf16.msra.mxu1 %v904_v9  ;;  %922 = vmatpush.bf16.msra.mxu3 %v904_v9 }
  0x3c   : > { %479 = vmatpush.bf16.msra.mxu0 %v895_v10  ;;  %915 = vmatpush.bf16.msra.mxu2 %v895_v10 }
  0x3d   : > { %528 = vmatpush.bf16.msra.mxu1 %v903_v11  ;;  %923 = vmatpush.bf16.msra.mxu3 %v903_v11 }
  0x40   : > { %480 = vmatpush.bf16.msra.mxu0 %v894_v12  ;;  %916 = vmatpush.bf16.msra.mxu2 %v894_v12 }
  0x41   : > { %529 = vmatpush.bf16.msra.mxu1 %v902_v13  ;;  %924 = vmatpush.bf16.msra.mxu3 %v902_v13 }
  0x44   : > { %481 = vmatpush.bf16.msra.mxu0 %v893_v14  ;;  %917 = vmatpush.bf16.msra.mxu2 %v893_v14 }
  0x45   : > { %530 = vmatpush.bf16.msra.mxu1 %v901_v15  ;;  %925 = vmatpush.bf16.msra.mxu3 %v901_v15 }
  0x47   : > { %482 = vmatmul.bf16.vlgmr.msra.gmra.mxu0 %v745_v24  ;;  %502 = vmatmul.bf16.vlgmr.msra.gmra.mxu2 %v777_v25 }
  0x48   : > { %531 = vmatmul.bf16.vlgmr.msra.gmra.mxu1 %v749_v26  ;;  %551 = vmatmul.bf16.vlgmr.msra.gmra.mxu3 %v781_v27 }
  0x57   : > { %487 = vmatmul.bf16.gmra.mxu0 %v753_v36  ;;  %507 = vmatmul.bf16.gmra.mxu2 %v785_v37 }
  0x58   : > { %536 = vmatmul.bf16.gmra.mxu1 %v757_v38  ;;  %556 = vmatmul.bf16.gmra.mxu3 %v789_v39 }
  0x67   : > { %492 = vmatmul.bf16.gmra.mxu0 %v761_v48  ;;  %512 = vmatmul.bf16.gmra.mxu2 %v793_v49 }
  0x68   : > { %541 = vmatmul.bf16.gmra.mxu1 %v765_v50  ;;  %561 = vmatmul.bf16.gmra.mxu3 %v797_v51 }
  0x77   : > { %497 = vmatmul.bf16.gmra.mxu0 %v769_v60  ;;  %517 = vmatmul.bf16.gmra.mxu2 %v801_v61 }
  0x78   : > { %546 = vmatmul.bf16.gmra.mxu1 %v773_v62  ;;  %566 = vmatmul.bf16.gmra.mxu3 %v805_v63 }
  0xc4   : > { %v483_v1 = vpop.f32.mrf.mxu0 }
  0xc5   : > { %v484_v2 = vadd.f32 %v1330_v0, %v483_v1  ;;  %v532_v3 = vpop.f32.mrf.mxu1 }
  0xc7   : > { %v533_v4 = vadd.f32 %v532_v3, %v484_v2 }
  0xc9   : > { %v572_v5 = vmax.f32 %v533_v4, 0.0 }
  0xca   : > { %v503_v6 = vpop.f32.mrf.mxu2 }
  0xcb   : > { %588 = vst [vmem:[%s1335_s22] sm:$0xff] %v572_v5  ;;  %v504_v7 = vadd.f32 %v1330_v0, %v503_v6  ;;  %v552_v8 = vpop.f32.mrf.mxu3 }
  0xcc   : > { %v485_v9 = vpop.f32.mrf.mxu0 }
  0xcd   : > { %v553_v10 = vadd.f32 %v552_v8, %v504_v7  ;;  %v486_v11 = vadd.f32 %v1330_v0, %v485_v9  ;;  %v534_v12 = vpop.f32.mrf.mxu1 }
  0xcf   : > { %v580_v13 = vmax.f32 %v553_v10, 0.0  ;;  %v535_v14 = vadd.f32 %v534_v12, %v486_v11 }
  0xd1   : > { %596 = vst [vmem:[%s1335_s22 + $0x40] sm:$0xff] %v580_v13  ;;  %v573_v15 = vmax.f32 %v535_v14, 0.0 }
  0xd2   : > { %v505_v16 = vpop.f32.mrf.mxu2 }
  0xd3   : > { %589 = vst [vmem:[%s1335_s22 + $0x8] sm:$0xff] %v573_v15  ;;  %v506_v17 = vadd.f32 %v1330_v0, %v505_v16  ;;  %v554_v18 = vpop.f32.mrf.mxu3 }
  0xd4   : > { %v488_v19 = vpop.f32.mrf.mxu0 }
  0xd5   : > { %v555_v20 = vadd.f32 %v554_v18, %v506_v17  ;;  %v489_v21 = vadd.f32 %v1330_v0, %v488_v19  ;;  %v537_v22 = vpop.f32.mrf.mxu1 }
  0xd7   : > { %v581_v23 = vmax.f32 %v555_v20, 0.0  ;;  %v538_v24 = vadd.f32 %v537_v22, %v489_v21 }
  0xd9   : > { %597 = vst [vmem:[%s1335_s22 + $0x48] sm:$0xff] %v581_v23  ;;  %v574_v25 = vmax.f32 %v538_v24, 0.0 }
  0xda   : > { %v508_v26 = vpop.f32.mrf.mxu2 }
  0xdb   : > { %590 = vst [vmem:[%s1335_s22 + $0x10] sm:$0xff] %v574_v25  ;;  %v509_v27 = vadd.f32 %v1330_v0, %v508_v26  ;;  %v557_v28 = vpop.f32.mrf.mxu3 }
  0xdc   : > { %v490_v29 = vpop.f32.mrf.mxu0 }
  0xdd   : > { %v558_v30 = vadd.f32 %v557_v28, %v509_v27  ;;  %v491_v31 = vadd.f32 %v1330_v0, %v490_v29  ;;  %v539_v32 = vpop.f32.mrf.mxu1 }
  0xdf   : > { %v582_v33 = vmax.f32 %v558_v30, 0.0  ;;  %v540_v34 = vadd.f32 %v539_v32, %v491_v31 }
  0xe1   : > { %598 = vst [vmem:[%s1335_s22 + $0x50] sm:$0xff] %v582_v33  ;;  %v575_v35 = vmax.f32 %v540_v34, 0.0 }
  0xe2   : > { %v510_v36 = vpop.f32.mrf.mxu2 }
  0xe3   : > { %591 = vst [vmem:[%s1335_s22 + $0x18] sm:$0xff] %v575_v35  ;;  %v511_v37 = vadd.f32 %v1330_v0, %v510_v36  ;;  %v559_v38 = vpop.f32.mrf.mxu3 }
  0xe4   : > { %v493_v39 = vpop.f32.mrf.mxu0 }
  0xe5   : > { %v560_v40 = vadd.f32 %v559_v38, %v511_v37  ;;  %v494_v41 = vadd.f32 %v1330_v0, %v493_v39  ;;  %v542_v42 = vpop.f32.mrf.mxu1 }
  0xe7   : > { %v583_v43 = vmax.f32 %v560_v40, 0.0  ;;  %v543_v44 = vadd.f32 %v542_v42, %v494_v41 }
  0xe9   : > { %599 = vst [vmem:[%s1335_s22 + $0x58] sm:$0xff] %v583_v43  ;;  %v576_v45 = vmax.f32 %v543_v44, 0.0 }
  0xea   : > { %v513_v46 = vpop.f32.mrf.mxu2 }
  0xeb   : > { %592 = vst [vmem:[%s1335_s22 + $0x20] sm:$0xff] %v576_v45  ;;  %v514_v47 = vadd.f32 %v1330_v0, %v513_v46  ;;  %v562_v48 = vpop.f32.mrf.mxu3 }
  0xec   : > { %v495_v49 = vpop.f32.mrf.mxu0 }
  0xed   : > { %v563_v50 = vadd.f32 %v562_v48, %v514_v47  ;;  %v496_v51 = vadd.f32 %v1330_v0, %v495_v49  ;;  %v544_v52 = vpop.f32.mrf.mxu1 }
  0xef   : > { %v584_v53 = vmax.f32 %v563_v50, 0.0  ;;  %v545_v54 = vadd.f32 %v544_v52, %v496_v51 }
  0xf1   : > { %600 = vst [vmem:[%s1335_s22 + $0x60] sm:$0xff] %v584_v53  ;;  %v577_v55 = vmax.f32 %v545_v54, 0.0 }
  0xf2   : > { %v515_v56 = vpop.f32.mrf.mxu2 }
  0xf3   : > { %593 = vst [vmem:[%s1335_s22 + $0x28] sm:$0xff] %v577_v55  ;;  %v516_v57 = vadd.f32 %v1330_v0, %v515_v56  ;;  %v564_v58 = vpop.f32.mrf.mxu3 }
  0xf4   : > { %v498_v59 = vpop.f32.mrf.mxu0 }
  0xf5   : > { %v565_v60 = vadd.f32 %v564_v58, %v516_v57  ;;  %v499_v61 = vadd.f32 %v1330_v0, %v498_v59  ;;  %v547_v62 = vpop.f32.mrf.mxu1 }
  0xf7   : > { %v585_v63 = vmax.f32 %v565_v60, 0.0  ;;  %v548_v1 = vadd.f32 %v547_v62, %v499_v61 }
  0xf9   : > { %601 = vst [vmem:[%s1335_s22 + $0x68] sm:$0xff] %v585_v63  ;;  %v578_v2 = vmax.f32 %v548_v1, 0.0 }
  0xfa   : > { %v518_v3 = vpop.f32.mrf.mxu2 }
  0xfb   : > { %594 = vst [vmem:[%s1335_s22 + $0x30] sm:$0xff] %v578_v2  ;;  %v519_v4 = vadd.f32 %v1330_v0, %v518_v3  ;;  %v567_v5 = vpop.f32.mrf.mxu3 }
  0xfc   : > { %v500_v6 = vpop.f32.mrf.mxu0 }
  0xfd   : > { %v568_v7 = vadd.f32 %v567_v5, %v519_v4  ;;  %v501_v8 = vadd.f32 %v1330_v0, %v500_v6  ;;  %v549_v9 = vpop.f32.mrf.mxu1 }
  0xff   : > { %v586_v10 = vmax.f32 %v568_v7, 0.0  ;;  %v550_v11 = vadd.f32 %v549_v9, %v501_v8 }
 0x101   : > { %602 = vst [vmem:[%s1335_s22 + $0x70] sm:$0xff] %v586_v10  ;;  %v579_v12 = vmax.f32 %v550_v11, 0.0 }
 0x102   : > { %v520_v13 = vpop.f32.mrf.mxu2 }
 0x103   : > { %595 = vst [vmem:[%s1335_s22 + $0x38] sm:$0xff] %v579_v12  ;;  %v521_v14 = vadd.f32 %v1330_v0, %v520_v13  ;;  %v569_v15 = vpop.f32.mrf.mxu3 }
 0x105   : > { %v570_v16 = vadd.f32 %v569_v15, %v521_v14 }
 0x107   : > { %v587_v17 = vmax.f32 %v570_v16, 0.0 }
 0x109   : > { %603 = vst [vmem:[%s1335_s22 + $0x78] sm:$0xff] %v587_v17 }
 0x10a   : > { %1093 = shalt.err (!%p1090_p12)
}
 0x10b   : > { %s1159_s6 = smov 128   ;;  %s1160_s19 = smov 8  }
 0x10c   : > { %932 = dma.vmem_to_hbm [thread:$0]  (%p1259_p3), %s619_s25, 2048, %s621_s26, %s605_s15, %s1159_s6, %s1159_s6, %s1160_s19  }
 0x10d PF: > { %p949_p13 = scmp.ge.s32.totalorder %s1152_s17, 2  ;;  %s635_s1 = sand.u32 1, %s1132_s12  }
 0x10e   : > { %s636_s20 = scalar_lea.sflag [#allocation4], %s635_s1 }
 0x10f   : > { %p943_p0 = pnand %p949_p13, %p1230_p6 }
 0x111   : > { %p944_p5 = pneg %p943_p0 }
 0x113   : > { %1127 = dma.done.wait (%p944_p5), %s636_s20, 2048  }
 0x114   : > { %1129 = vsyncadd (%p944_p5), %s636_s20, 4294965248  ;;  %s20_s17 = sadd.s32 1, %s1152_s17   ;;  %s1419_s12 = smov %s1136_s13 }
 0x115   : > { %p17_p7 = scmp.ge.s32.totalorder %s20_s17, 18   ;;  %s1420_s13 = smov %s1140_s14 }
 0x116   : > { %s1421_s14 = smov %s1268_s18  ;;  %s1422_s15 = smov %s1148_s16 }
 0x117   : > { %s1423_s16 = smov %s1425_s5  ;;  %19 = sbr.rel (!%p17_p7) target bundleno = 9 (0x9), region = 85 }
 0x11c   :  { %642 = vsyncpa [#allocation3], 1 }
 0x11d   :  { %644 = vsyncpa [#allocation3 + $0x1], 1 }
 0x11e   :  { %645 = vsyncpa [#allocation6], 1 }
 0x11f   :  { %646 = vsyncpa [#allocation4], 1 }
 0x120   :  { %648 = vsyncpa [#allocation4 + $0x1], 1 }

</bundles_post_ra>
